<compile_context>
chip_gen: v7x
topology: tpu7x:2x2x1
jax: 0.10.0
libtpu: 0.0.40
codegen_flags: <defaults>
</compile_context>

<pallas_src>
import functools

import jax
import jax.numpy as jnp
from jax import lax
from jax.experimental import pallas as pl
from jax.experimental.pallas import tpu as pltpu


# --------------------------------------------------------------------------------------
# helpers
# --------------------------------------------------------------------------------------
def _choose_tile(S, max_tile=512):
    """Largest multiple-of-128 tile <= max_tile that divides S (else the full S)."""
    if S % 128 != 0:
        return S
    t = min(max_tile, S)
    t -= t % 128
    while t > 0:
        if S % t == 0:
            return t
        t -= 128
    return S


# --------------------------------------------------------------------------------------
# Pallas kernel 1: 1x1 conv == channel matmul (MXU), bias fused, optional fused residual
# --------------------------------------------------------------------------------------
def _conv1x1_kernel(x_ref, w_ref, b_ref, o_ref):
    x = x_ref[0].astype(jnp.float32)                      # (C_in, tS)
    w = w_ref[...].astype(jnp.float32)                    # (C_out, C_in)
    y = jnp.dot(w, x, preferred_element_type=jnp.float32)
    y = y + b_ref[...].astype(jnp.float32)                # bias (C_out, 1) broadcasts over lanes
    o_ref[0] = y.astype(o_ref.dtype)


def _conv1x1_res_kernel(x_ref, r_ref, w_ref, b_ref, o_ref):
    x = x_ref[0].astype(jnp.float32) + r_ref[0].astype(jnp.float32)
    w = w_ref[...].astype(jnp.float32)
    y = jnp.dot(w, x, preferred_element_type=jnp.float32)
    y = y + b_ref[...].astype(jnp.float32)
    o_ref[0] = y.astype(o_ref.dtype)


def conv1x1_pallas(x, w, b, residual=None, *, max_tile=512):
    """x: (B, C_in, S) -> (B, C_out, S).  Optionally computes W @ (x + residual) + b."""
    B, C_in, S = x.shape
    C_out = w.shape[0]
    tS = _choose_tile(S, max_tile)
    grid = (B, S // tS)

    x_spec = pl.BlockSpec((1, C_in, tS), lambda bi, si: (bi, 0, si))
    w_spec = pl.BlockSpec((C_out, C_in), lambda bi, si: (0, 0))
    b_spec = pl.BlockSpec((C_out, 1), lambda bi, si: (0, 0))
    o_spec = pl.BlockSpec((1, C_out, tS), lambda bi, si: (bi, 0, si))
    b2 = b.reshape(C_out, 1)

    if residual is None:
        kern = _conv1x1_kernel
        operands = (x, w, b2)
        in_specs = [x_spec, w_spec, b_spec]
    else:
        kern = _conv1x1_res_kernel
        operands = (x, residual, w, b2)
        in_specs = [x_spec, x_spec, w_spec, b_spec]

    return pl.pallas_call(
        kern,
        out_shape=jax.ShapeDtypeStruct((B, C_out, S), x.dtype),
        grid_spec=pltpu.PrefetchScalarGridSpec(
            num_scalar_prefetch=0,
            grid=grid,
            in_specs=in_specs,
            out_specs=o_spec,
        ),
        compiler_params=pltpu.CompilerParams(
            dimension_semantics=("parallel", "parallel")),
    )(*operands)


# --------------------------------------------------------------------------------------
# Pallas kernel 2: fused neighborhood attention (logits -> softmax -> weighted V sum)
# --------------------------------------------------------------------------------------
def _na_kernel(q_ref, k_ref, v_ref, o_ref, *, scale, kk2):
    q = q_ref[0].astype(jnp.float32)                       # (c, tS)

    # logits per neighborhood position (kk2 = K*K is small & static -> unrolled)
    logits = []
    for r in range(kk2):
        kr = k_ref[0, r].astype(jnp.float32)               # (c, tS)
        logits.append(jnp.sum(q * kr, axis=0, keepdims=True) * scale)
    s = jnp.concatenate(logits, axis=0)                    # (kk2, tS)

    # softmax over the neighborhood axis (sublane reduce)
    m = jnp.max(s, axis=0, keepdims=True)
    p = jnp.exp(s - m)
    denom = jnp.sum(p, axis=0, keepdims=True)
    inv = pl.reciprocal(denom, approx=False)

    # weighted sum of values
    acc = jnp.zeros_like(q)
    for r in range(kk2):
        vr = v_ref[0, r].astype(jnp.float32)
        acc = acc + p[r:r + 1, :] * vr
    o_ref[0] = (acc * inv).astype(o_ref.dtype)


def na2d_pallas(q, k_nbr, v_nbr, *, scale, max_tile=512):
    """q: (BG, c, S); k_nbr, v_nbr: (BG, KK, c, S) -> (BG, c, S)."""
    BG, c, S = q.shape
    KK = k_nbr.shape[1]
    tS = _choose_tile(S, max_tile)
    grid = (BG, S // tS)
    kern = functools.partial(_na_kernel, scale=scale, kk2=KK)

    return pl.pallas_call(
        kern,
        out_shape=jax.ShapeDtypeStruct((BG, c, S), q.dtype),
        grid_spec=pltpu.PrefetchScalarGridSpec(
            num_scalar_prefetch=0,
            grid=grid,
            in_specs=[
                pl.BlockSpec((1, c, tS), lambda bi, si: (bi, 0, si)),
                pl.BlockSpec((1, KK, c, tS), lambda bi, si: (bi, 0, 0, si)),
                pl.BlockSpec((1, KK, c, tS), lambda bi, si: (bi, 0, 0, si)),
            ],
            out_specs=pl.BlockSpec((1, c, tS), lambda bi, si: (bi, 0, si)),
        ),
        compiler_params=pltpu.CompilerParams(
            dimension_semantics=("parallel", "parallel")),
    )(q, k_nbr, v_nbr)


# --------------------------------------------------------------------------------------
# plain-JAX pieces (irregular / data-dependent) shared by Pallas and reference paths
# --------------------------------------------------------------------------------------
def _depthwise_conv(x, w, b, *, stride=1, padding=0):
    """x (N, C, H, W), w (C, 1, kh, kw), b (C,) or None.  TODO(synk): no Pallas depthwise conv."""
    C = x.shape[1]
    y = lax.conv_general_dilated(
        x, w, window_strides=(stride, stride),
        padding=[(padding, padding), (padding, padding)],
        dimension_numbers=("NCHW", "OIHW", "NCHW"),
        feature_group_count=C)
    if b is not None:
        y = y + b[None, :, None, None]
    return y


def _layernorm2d(x, gamma, beta, eps=1e-6):
    """ultralytics LayerNorm2d: normalize over the channel dim per (b, h, w)."""
    u = jnp.mean(x, axis=1, keepdims=True)
    s = jnp.mean((x - u) ** 2, axis=1, keepdims=True)
    xn = (x - u) / jnp.sqrt(s + eps)
    return gamma[None, :, None, None] * xn + beta[None, :, None, None]


def _ref_points(Hk, Wk, BG, dtype):
    ref_y = (jnp.arange(Hk, dtype=dtype) + 0.5) / (Hk - 1.0) * 2.0 - 1.0
    ref_x = (jnp.arange(Wk, dtype=dtype) + 0.5) / (Wk - 1.0) * 2.0 - 1.0
    ry, rx = jnp.meshgrid(ref_y, ref_x, indexing="ij")
    ref = jnp.stack([ry, rx], axis=-1)                       # (Hk, Wk, 2) = (y, x)
    return jnp.broadcast_to(ref[None], (BG, Hk, Wk, 2))


def _grid_sample_bilinear(img, grid):
    """torch.nn.functional.grid_sample(mode='bilinear', align_corners=True, padding='zeros').

    img (N, C, H, W), grid (N, Ho, Wo, 2) with grid[...,0]=x, grid[...,1]=y in [-1, 1].
    TODO(synk): deformable sampling is a data-dependent gather; kept in JAX (XLA gather).
    """
    N, C, H, W = img.shape
    gx = (grid[..., 0] + 1.0) * 0.5 * (W - 1)
    gy = (grid[..., 1] + 1.0) * 0.5 * (H - 1)
    x0 = jnp.floor(gx)
    y0 = jnp.floor(gy)
    x1 = x0 + 1.0
    y1 = y0 + 1.0
    wx1 = gx - x0
    wx0 = 1.0 - wx1
    wy1 = gy - y0
    wy0 = 1.0 - wy1
    flat = img.reshape(N, C, H * W)

    def gather(yi, xi):
        valid = (xi >= 0) & (xi <= W - 1) & (yi >= 0) & (yi <= H - 1)
        xc = jnp.clip(xi, 0, W - 1).astype(jnp.int32)
        yc = jnp.clip(yi, 0, H - 1).astype(jnp.int32)
        idx = (yc * W + xc).reshape(N, 1, -1)
        g = jnp.take_along_axis(flat, idx, axis=2).reshape(N, C, *xi.shape[1:])
        return g * valid.astype(img.dtype)[:, None]

    out = (gather(y0, x0) * (wy0 * wx0)[:, None]
           + gather(y0, x1) * (wy0 * wx1)[:, None]
           + gather(y1, x0) * (wy1 * wx0)[:, None]
           + gather(y1, x1) * (wy1 * wx1)[:, None])
    return out


def _neighbor_indices(H, W, K):
    """NATTEN non-causal, dilation=1 window: flat key index per query pixel and kernel offset."""
    nh = (K - 1) // 2
    start_h = jnp.clip(jnp.arange(H) - nh, 0, H - K)          # (H,)
    start_w = jnp.clip(jnp.arange(W) - nh, 0, W - K)          # (W,)
    off = jnp.arange(K)
    nbr_h = start_h[:, None] + off[None, :]                   # (H, K)
    nbr_w = start_w[:, None] + off[None, :]                   # (W, K)
    idx = nbr_h[:, None, :, None] * W + nbr_w[None, :, None, :]   # (H, W, K, K)
    return idx.transpose(2, 3, 0, 1).reshape(K * K, H * W).astype(jnp.int32)


# --------------------------------------------------------------------------------------
# pure-JAX references for the Pallas pieces (correctness check)
# --------------------------------------------------------------------------------------
def _conv1x1_ref(x, w, b, residual=None):
    if residual is not None:
        x = x + residual
    y = jnp.einsum("oc,bcs->bos", w, x, precision="highest")
    return y + b[None, :, None]


def _na2d_ref(q, k_nbr, v_nbr, *, scale):
    s = jnp.einsum("bcs,brcs->brs", q, k_nbr, precision="highest") * scale
    p = jax.nn.softmax(s, axis=1)
    return jnp.einsum("brs,brcs->bcs", p, v_nbr, precision="highest")


# --------------------------------------------------------------------------------------
# full forward pass
# --------------------------------------------------------------------------------------
def dna_forward(params, x, *, num_heads, kernel_size, dilation=1, stride=1,
                offset_range_factor=1.0, use_pallas=True):
    B, C, H, W = x.shape
    G = num_heads
    gc = C // G                      # n_group_channels == n_head_channels
    scale = gc ** (-0.5)
    K = kernel_size
    S = H * W
    assert dilation == 1, "TODO(synk): dilation>1 needs NATTEN dilation-group windows"
    assert stride == 1, "stride=1 path (x_sampled must reshape back to (B,C,H,W))"

    conv1x1 = conv1x1_pallas if use_pallas else _conv1x1_ref
    na2d = na2d_pallas if use_pallas else _na2d_ref

    x_flat = x.reshape(B, C, S)

    # ---- q projection (Pallas MXU 1x1 conv) ----
    q = conv1x1(x_flat, params["wq"], params["bq"])           # (B, C, S)
    q_img = q.reshape(B, C, H, W)

    # ---- offset branch: depthwise conv + LayerNorm2d + GELU + 1x1 (plain JAX) ----
    pad = K // 2 if K != stride else 0
    q_off = q_img.reshape(B * G, gc, H, W)
    t = _depthwise_conv(q_off, params["off_dw_w"], params["off_dw_b"],
                        stride=stride, padding=pad)
    t = _layernorm2d(t, params["off_ln_g"], params["off_ln_b"])
    t = jax.nn.gelu(t, approximate=False)
    offset = jnp.einsum("oc,bchw->bohw", params["off_pw_w"], t)   # (BG, 2, Hk, Wk), no bias
    Hk, Wk = offset.shape[2], offset.shape[3]
    off_range = jnp.array([1.0 / (Hk - 1.0), 1.0 / (Wk - 1.0)],
                          dtype=x.dtype).reshape(1, 2, 1, 1)
    offset = jnp.tanh(offset) * off_range * offset_range_factor
    offset = jnp.transpose(offset, (0, 2, 3, 1))                  # (BG, Hk, Wk, 2) = (y, x)
    reference = _ref_points(Hk, Wk, B * G, x.dtype)
    pos = offset + reference                                      # offset_range_factor >= 0: no clamp

    # ---- deformable sampling (plain JAX bilinear grid_sample) ----
    grid_xy = pos[..., ::-1]                                      # (x, y) ordering
    x_sampled = _grid_sample_bilinear(x.reshape(B * G, gc, H, W), grid_xy)
    x_sampled = x_sampled.reshape(B, C, S)                        # Hk*Wk == S for stride=1

    # ---- LePE: depthwise 3x3 conv on q (plain JAX) ----
    lepe = _depthwise_conv(q_img, params["rpe_w"], params["rpe_b"], stride=1, padding=1)
    lepe_flat = lepe.reshape(B, C, S)

    # ---- k / v projections (Pallas) ----
    k = conv1x1(x_sampled, params["wk"], params["bk"])
    v = conv1x1(x_sampled, params["wv"], params["bv"])

    # ---- K*K neighborhood gather (wrapper side) ----
    # TODO(synk): fold this gather into the attention kernel via manual DMA instead of
    #             materializing K*K shifted key/value copies.
    idx = _neighbor_indices(H, W, K)                              # (KK, S)
    q_g = q.reshape(B * G, gc, S)
    k_nbr = jnp.transpose(k.reshape(B * G, gc, S)[:, :, idx], (0, 2, 1, 3))   # (BG, KK, gc, S)
    v_nbr = jnp.transpose(v.reshape(B * G, gc, S)[:, :, idx], (0, 2, 1, 3))

    # ---- fused neighborhood attention (Pallas) ----
    out = na2d(q_g, k_nbr, v_nbr, scale=scale)                    # (BG, gc, S)
    out = out.reshape(B, C, S)

    # ---- output projection with fused "+ residual_lepe" (Pallas) ----
    y = conv1x1(out, params["wo"], params["bo"], residual=lepe_flat)
    return y.reshape(B, C, H, W)


# --------------------------------------------------------------------------------------
# demo / correctness check
# --------------------------------------------------------------------------------------
if __name__ == "__main__":
    B, dim, num_heads, K, H, W = 2, 32, 4, 3, 16, 16
    gc = dim // num_heads

    key = jax.random.PRNGKey(0)
    keys = jax.random.split(key, 16)

    def rnd(k, shape, s=0.1):
        return jax.random.normal(k, shape, dtype=jnp.float32) * s

    params = dict(
        wq=rnd(keys[0], (dim, dim)), bq=rnd(keys[1], (dim,)),
        wk=rnd(keys[2], (dim, dim)), bk=rnd(keys[3], (dim,)),
        wv=rnd(keys[4], (dim, dim)), bv=rnd(keys[5], (dim,)),
        wo=rnd(keys[6], (dim, dim)), bo=rnd(keys[7], (dim,)),
        off_dw_w=rnd(keys[8], (gc, 1, K, K)), off_dw_b=rnd(keys[9], (gc,)),
        off_ln_g=jnp.ones((gc,), jnp.float32), off_ln_b=jnp.zeros((gc,), jnp.float32),
        off_pw_w=rnd(keys[10], (2, gc)),
        rpe_w=rnd(keys[11], (dim, 1, 3, 3)), rpe_b=rnd(keys[12], (dim,)),
    )
    x = jax.random.normal(keys[13], (B, dim, H, W), dtype=jnp.float32)

    y = jax.block_until_ready(
        dna_forward(params, x, num_heads=num_heads, kernel_size=K, use_pallas=True))
    y_ref = dna_forward(params, x, num_heads=num_heads, kernel_size=K, use_pallas=False)

    assert y.shape == (B, dim, H, W)
    max_err = jnp.max(jnp.abs(y - y_ref))
    assert jnp.allclose(y, y_ref, atol=2e-3, rtol=2e-3), f"mismatch, max abs err = {max_err}"
    print("KERNEL_OK")
</pallas_src>

<mosaic_0001>
module attributes {stable_mosaic.version = 11 : i64} {
  func.func @_conv1x1_kernel(%arg0: i32, %arg1: i32, %arg2: memref<1x32x256xf32, #tpu.memory_space<vmem>>, %arg3: memref<32x32xf32, #tpu.memory_space<vmem>>, %arg4: memref<32x1xf32, #tpu.memory_space<vmem>>, %arg5: memref<1x32x256xf32, #tpu.memory_space<vmem>>) attributes {dimension_semantics = [#tpu.dimension_semantics<parallel>, #tpu.dimension_semantics<parallel>], iteration_bounds = array<i64: 2, 1>, scalar_prefetch = 0 : i64, scratch_operands = 0 : i64, tpu.core_type = #tpu.core_type<tc>, window_params = [{transform_indices = @transform_0, window_bounds = array<i64: 1, 32, 256>}, {pipeline_mode = #tpu.pipeline_mode<synchronous>, transform_indices = @transform_1, window_bounds = array<i64: 32, 32>}, {pipeline_mode = #tpu.pipeline_mode<synchronous>, transform_indices = @transform_2, window_bounds = array<i64: 32, 1>}, {transform_indices = @transform_3, window_bounds = array<i64: 1, 32, 256>}]} {
    %c0 = arith.constant 0 : index
    %c0_0 = arith.constant 0 : index
    %c0_1 = arith.constant 0 : index
    %0 = vector.load %arg2[%c0, %c0_0, %c0_1] : memref<1x32x256xf32, #tpu.memory_space<vmem>>, vector<1x32x256xf32>
    %1 = vector.shape_cast %0 : vector<1x32x256xf32> to vector<32x256xf32>
    %c0_2 = arith.constant 0 : index
    %c0_3 = arith.constant 0 : index
    %2 = vector.load %arg3[%c0_2, %c0_3] : memref<32x32xf32, #tpu.memory_space<vmem>>, vector<32x32xf32>
    %cst = arith.constant dense<0.000000e+00> : vector<32x256xf32>
    %3 = tpu.matmul %2, %1, %cst {dimension_numbers = #tpu.dot_dimension_numbers<[1], [0], [0], [1], [0, 0, 1, 1], [], []>} : vector<32x32xf32>, vector<32x256xf32>, vector<32x256xf32> -> vector<32x256xf32>
    %c0_4 = arith.constant 0 : index
    %c0_5 = arith.constant 0 : index
    %4 = vector.load %arg4[%c0_4, %c0_5] : memref<32x1xf32, #tpu.memory_space<vmem>>, vector<32x1xf32>
    %5 = vector.broadcast %4 : vector<32x1xf32> to vector<32x256xf32>
    %6 = arith.addf %3, %5 : vector<32x256xf32>
    %c0_6 = arith.constant 0 : index
    %c0_7 = arith.constant 0 : index
    %c0_8 = arith.constant 0 : index
    %7 = vector.load %arg5[%c0_6, %c0_7, %c0_8] : memref<1x32x256xf32, #tpu.memory_space<vmem>>, vector<1x32x256xf32>
    %8 = vector.shape_cast %7 : vector<1x32x256xf32> to vector<32x256xf32>
    %9 = vector.shape_cast %6 : vector<32x256xf32> to vector<1x32x256xf32>
    tpu.vector_store %arg5[%c0_6, %c0_7, %c0_8], %9 {strides = array<i32>} : memref<1x32x256xf32, #tpu.memory_space<vmem>>, vector<1x32x256xf32>,
    return
  }
  func.func @transform_0(%arg0: i32, %arg1: i32) -> (i32, i32, i32) {
    %c0_i32 = arith.constant 0 : i32
    %c0_i32_0 = arith.constant 0 : i32
    return %arg0, %c0_i32, %arg1 : i32, i32, i32
  }
  func.func @transform_1(%arg0: i32, %arg1: i32) -> (i32, i32) {
    %c0_i32 = arith.constant 0 : i32
    %c0_i32_0 = arith.constant 0 : i32
    %c0_i32_1 = arith.constant 0 : i32
    return %c0_i32, %c0_i32_0 : i32, i32
  }
  func.func @transform_2(%arg0: i32, %arg1: i32) -> (i32, i32) {
    %c0_i32 = arith.constant 0 : i32
    %c0_i32_0 = arith.constant 0 : i32
    %c0_i32_1 = arith.constant 0 : i32
    return %c0_i32, %c0_i32_0 : i32, i32
  }
  func.func @transform_3(%arg0: i32, %arg1: i32) -> (i32, i32, i32) {
    %c0_i32 = arith.constant 0 : i32
    %c0_i32_0 = arith.constant 0 : i32
    return %arg0, %c0_i32, %arg1 : i32, i32, i32
  }
}

</mosaic_0001>

<bundles_post_ra>
// kernel: tpu_custom_call.1
= control target key start
LH: loop header
LB: loop body
LE: loop exit
PB: predicated region body
PF: predicated region fallthrough
CT: control target
= control target key end

     0   :  { %8 = vsyncpa [#allocation3], 0  ;;  %s906_s0 = inlined_call_operand.hbm [shape: f32[2,32,256], index: 0, kind: input, shape index: {}]   ;;  %s907_s1 = inlined_call_operand.vmem [shape: f32[32,32], index: 1, kind: input, shape index: {}]   ;;  %s908_s2 = inlined_call_operand.vmem [shape: f32[32,1], index: 2, kind: input, shape index: {}]   ;;  %s909_s3 = inlined_call_operand.hbm [shape: f32[2,32,256], index: 3, kind: output, shape index: {}]  }
   0x1   :  { %10 = vsyncpa [#allocation3 + $0x1], 0 }
   0x2   :  { %11 = vsyncpa [#allocation4], 0 }
   0x3   :  { %13 = vsyncpa [#allocation4 + $0x1], 0  ;;  %s703_s12 = smov 0   ;;  %s705_s13 = smov 0  }
   0x4   :  { %s707_s14 = smov 0   ;;  %s709_s15 = smov 0  }
   0x5   :  { %s711_s16 = smov 0   ;;  %s713_s17 = smov 0  }
   0x6 LB: > { %s458_s18 = sadd.s32 4294967295, %s673_s17   ;;  %s459_s19 = sadd.s32 4294967294, %s673_s17   ;;  %s673_s17 = sphi %s713_s17, %s19_s17   ;;  %s669_s16 = sphi %s711_s16, %s924_s16   ;;  %s665_s15 = sphi %s709_s15, %s923_s15   ;;  %s661_s14 = sphi %s707_s14, %s922_s14   ;;  %s657_s13 = sphi %s705_s13, %s921_s13   ;;  %s653_s12 = sphi %s703_s12, %s920_s12  }
   0x7   : > { %s31_s20 = sadd.s32 1, %s669_s16  ;;  %s40_s21 = sadd.s32 1, %s661_s14 }
   0x8   : > { %p33_p0 = scmp.ge.s32.totalorder %s31_s20, 2  ;;  %p47_p1 = scmp.ne.s32.totalorder %s661_s14, %s657_s13 }
   0x9   : > { %p48_p2 = scmp.eq.s32.totalorder %s673_s17, 0  ;;  %p53_p3 = scmp.ne.s32.totalorder %s657_s13, %s653_s12 }
   0xa   : > { %s926_s20 = smov (%p33_p0, %s31_s20), 0  ;;  %p54_p5 = scmp.eq.s32.totalorder %s458_s18, 0 }
   0xb   : > { %p744_p4 = por %p48_p2, %p47_p1  ;;  %s35_s23 = ssub.s32 %s669_s16, %s926_s20 }
   0xc   : > { %p121_p6 = scmp.eq.s32.totalorder %s458_s18, 1  ;;  %p38_p7 = scmp.eq.s32.totalorder %s35_s23, 0 }
   0xd   : > { %p750_p8 = por %p54_p5, %p53_p3  ;;  %p127_p10 = scmp.eq.s32.totalorder %s459_s19, 1 }
   0xe   : > { %p754_p9 = por %p121_p6, %p47_p1  ;;  %p503_p13 = scmp.lt.s32.totalorder %s673_s17, 2 }
   0xf   : > { %s759_s26 = scalar_select %p38_p7, %s661_s14, %s40_s21  }
  0x10   : > { %s913_s25 = scalar_select %p754_p9, 1, 0 }
  0x11   : > { %p761_p11 = por %p127_p10, %p53_p3  ;;  %s153_s28 = sand.u32 1, %s661_s14  }
  0x12   : > { %s462_s29 = sshll.u32 %s153_s28, 6  ;;  %s477_s30 = sshll.u32 %s669_s16, 10 }
  0x13   : > { %s914_s27 = scalar_select %p761_p11, 1, 0 }
  0x14   : > { %s772_s6 = scalar_lea.hbm %s906_s0, %s477_s30  ;;  %s157_s7 = scalar_lea.vmem [#allocation2], %s462_s29 }
  0x15   : > { %s166_s8 = sshll.u32 %s157_s7, 4  ;;  %p778_p0 = pnand %p503_p13, %p744_p4  ;;  %s774_s8 = int_to_ptr.vmem [resolvable:$true] %s166_s8 }
  0x16   : > { %s783_s10 = scalar_lea.sflag [#allocation3], %s153_s28  ;;  %s561_s11 = scalar_lea.hbm %s772_s6, 1024 }
  0x17   : > { %p562_p2 = scmp.ne.s32.totalorder %s772_s6, %s561_s11  ;;  %p563_p3 = pneg %p778_p0 }
  0x18   : > { %s566_s21 = scalar_lea.hbm %s906_s0, 2048  ;;  %p567_p4 = scmp.lt.u32.totalorder %s772_s6, %s906_s0 }
  0x19   : > { %p564_p5 = pnand %p563_p3, %p562_p2  ;;  %p568_p7 = scmp.lt.u32.totalorder %s566_s21, %s561_s11 }
  0x1a   : > { %p570_p13 = scmp.lt.u32.totalorder %s561_s11, %s772_s6 }
  0x1b   : > { %p565_p6 = pneg %p564_p5  ;;  %p569_p10 = por %p568_p7, %p567_p4 }
  0x1d   : > { %p571_p12 = por %p570_p13, %p569_p10 }
  0x1f   : > { %p572_p1 = pnand %p571_p12, %p565_p6 }
  0x21   : > { %575 = shalt.err (!%p572_p1)
}
  0x22   : > { %s576_s28 = scalar_lea.vmem %s774_s8, 1024  ;;  %s675_s29 = smov [#allocation2]  }
  0x23   : > { %p577_p2 = scmp.ne.s32.totalorder %s774_s8, %s576_s28  ;;  %s581_s30 = sshll.u32 %s675_s29, 4  ;;  %s582_s30 = int_to_ptr.vmem [resolvable:$false] %s581_s30 }
  0x24   : > { %s583_s4 = scalar_lea.vmem %s582_s30, 2048  ;;  %p584_p9 = scmp.lt.s32.totalorder %s774_s8, %s582_s30 }
  0x25   : > { %p579_p5 = pnand %p577_p2, %p563_p3  ;;  %p585_p4 = scmp.lt.s32.totalorder %s583_s4, %s576_s28 }
  0x27   : > { %p580_p11 = pneg %p579_p5  ;;  %p586_p7 = por %p585_p4, %p584_p9 }
  0x29   : > { %p587_p10 = pnand %p586_p7, %p580_p11 }
  0x2b   : > { %590 = shalt.err (!%p587_p10)
}
  0x2c   : > { %s676_s5 = smov 256   ;;  %s677_s7 = smov 16  }
  0x2d   : > { %498 = dma.hbm_to_vmem [thread:$0]  (!%p778_p0), %s772_s6, 1024, %s774_s8, %s783_s10, %s676_s5, %s676_s5, %s677_s7  }
  0x2e   : > { %p174_p12 = scmp.lt.s32.totalorder %s673_s17, 3  ;;  %p916_p1 = scmp.ge.s32.totalorder %s673_s17, 1 }
  0x30   : > { %p175_p3 = pnand %p916_p1, %p174_p12 }
  0x31   : > { %s815_s11 = sand.u32 (!%p175_p3), 1, %s657_s13  }
  0x32   : > { %178 = sbr.rel (%p175_p3) target bundleno = 303 (0x12f), region = 32  ;;  %s466_s18 = sshll.u32 (!%p175_p3), %s815_s11, 6 }
  0x33   : > { %s181_s19 = scalar_lea.sflag (!%p175_p3), [#allocation3], %s815_s11  ;;  %s184_s21 = scalar_lea.vmem (!%p175_p3), [#allocation2], %s466_s18 }
  0x39   : > { %644 = dma.done.wait (%p750_p8), %s181_s19, 1024  }
  0x3a   : > { %646 = vsyncadd (%p750_p8), %s181_s19, 4294966272  ;;  %v678_v0 = vmov 0.0   ;;  %v679_v1 = vmov 0   ;;  %v210_v2 = vld [vmem:[%s184_s21 + $0x8] sm:$0xff]  ;;  %v212_v3 = vld [vmem:[%s184_s21 + $0x18] sm:$0xff]  ;;  %vm245_vm0 = vcmask 261120  }
  0x3b   : > { %322 = vmatprep.mubr.f32.mxu0 %v678_v0  ;;  %334 = vmatprep.mubr.f32.mxu1 %v678_v0  ;;  %v209_v4 = vld [vmem:[%s184_s21] sm:$0xff]  ;;  %v479_v5 = vpack.c.bf16 %v212_v3, %v210_v2  ;;  %v211_v6 = vld [vmem:[%s184_s21 + $0x10] sm:$0xff]  ;;  %v214_v7 = vld [vmem:[%s184_s21 + $0x28] sm:$0xff]  ;;  %s206_s6 = scalar_lea.vmem [#allocation5], %s466_s18  ;;  %s478_s9 = sshll.u32 %s665_s15, 10 }
  0x3c   : > { %560 = vset.pattern.permute.xlu1 %v679_v1  ;;  %559 = vset.pattern.permute.xlu0 %v679_v1  ;;  %v216_v8 = vld [vmem:[%s184_s21 + $0x38] sm:$0xff]  ;;  %v481_v9 = vpack.c.bf16 %v211_v6, %v209_v4  ;;  %v213_v11 = vld [vmem:[%s184_s21 + $0x20] sm:$0xff]  ;;  %v215_v12 = vld [vmem:[%s184_s21 + $0x30] sm:$0xff]  ;;  %s371_s8 = sshll.u32 %s206_s6, 4  ;;  %s857_s10 = scalar_lea.hbm %s909_s3, %s478_s9  ;;  %s852_s8 = int_to_ptr.vmem [resolvable:$true] %s371_s8 }
  0x3d   : > { %v483_v10 = vpack.c.bf16 %v216_v8, %v214_v7  ;;  %480 = vmatprep.subr.bf16.mxu0 %v479_v5  ;;  %487 = vmatprep.subr.bf16.mxu1 %v479_v5  ;;  %v485_v13 = vpack.c.bf16 %v215_v12, %v213_v11  ;;  %v223_v14 = vld [vmem:[%s908_s2 + $0x10] sm:$0xff]  ;;  %v221_v15 = vld [vmem:[%s908_s2] sm:$0xff]  ;;  %v224_v16 = vld [vmem:[%s908_s2 + $0x18] sm:$0xff]  ;;  %s356_s22 = scalar_lea.sflag [#allocation4], %s815_s11  ;;  %s591_s23 = scalar_lea.vmem %s852_s8, 1024 }
  0x3e   : > { %482 = vmatpush1.bf16.msra.mxu0 %v481_v9  ;;  %489 = vmatpush1.bf16.msra.mxu1 %v481_v9  ;;  %v222_v17 = vld [vmem:[%s908_s2 + $0x8] sm:$0xff]  ;;  %v217_v18 = vld [vmem:[%s907_s1] sm:$0xff]  ;;  %v219_v19 = vld [vmem:[%s907_s1 + $0x10] sm:$0xff]  ;;  %p592_p8 = scmp.ne.s32.totalorder %s852_s8, %s591_s23  ;;  %p917_p9 = scmp.ne.s32.totalorder %s913_s25, 0 }
  0x3f   : > { %484 = vmatprep.subr.bf16.mxu0 %v483_v10  ;;  %488 = vmatprep.subr.bf16.mxu1 %v483_v10  ;;  %v218_v20 = vld [vmem:[%s907_s1 + $0x8] sm:$0xff]  ;;  %v220_v21 = vld [vmem:[%s907_s1 + $0x18] sm:$0xff]  ;;  %s680_s28 = smov [#allocation5]  }
  0x40   : > { %237 = vperm.xlu1 %560, %v223_v14   ;;  %227 = vperm.xlu0 %559, %v221_v15   ;;  %p593_p11 = pnand %p592_p8, %p917_p9  ;;  %s595_s29 = sshll.u32 %s680_s28, 4  ;;  %s596_s29 = int_to_ptr.vmem [resolvable:$false] %s595_s29 }
  0x41   : > { %s597_s30 = scalar_lea.vmem %s596_s29, 2048  ;;  %p598_p6 = scmp.lt.s32.totalorder %s852_s8, %s596_s29 }
  0x42   : > { %486 = vmatpush1.bf16.msra.mxu0 %v485_v13  ;;  %490 = vmatpush1.bf16.msra.mxu1 %v485_v13  ;;  %p594_p0 = pneg %p593_p11  ;;  %p599_p13 = scmp.lt.s32.totalorder %s597_s30, %s591_s23 }
  0x44   : > { %242 = vperm.xlu1 %560, %v224_v16   ;;  %232 = vperm.xlu0 %559, %v222_v17   ;;  %p600_p2 = por %p599_p13, %p598_p6 }
  0x45   : > { %468 = vmatmul.mubr.msk.f32.vlgmr.msra.gmra.mrb[0].mxu0 %vm245_vm0, %v217_v18  ;;  %470 = vmatmul.mubr.msk.f32.vlgmr.msra.gmra.mrb[0].mxu1 %vm245_vm0, %v219_v19 }
  0x46   : > { %328 = vmatprep.mubr.f32.mxu0 %v678_v0  ;;  %340 = vmatprep.mubr.f32.mxu1 %v678_v0  ;;  %p601_p5 = pnand %p600_p2, %p594_p0 }
  0x49   : > { %469 = vmatmul.mubr.msk.f32.gmra.mrb[2].mxu0 %vm245_vm0, %v218_v20  ;;  %471 = vmatmul.mubr.msk.f32.gmra.mrb[2].mxu1 %vm245_vm0, %v220_v21 }
  0xbf   : > { %v238_v22 = vpop.permute.xlu1 %237  ;;  %v228_v23 = vpop.permute.xlu0 %227 }
  0xc3   : > { %v243_v32 = vpop.permute.xlu1 %242  ;;  %v233_v33 = vpop.permute.xlu0 %232 }
 0x118   : > { %v324_v24 = vpop.f32.mrb[0].mxu0  ;;  %v336_v25 = vpop.f32.mrb[0].mxu1 }
 0x119   : > { %v325_v26 = vadd.f32 %v324_v24, %v228_v23  ;;  %v337_v27 = vadd.f32 %v336_v25, %v238_v22  ;;  %v326_v28 = vpop.f32.mrb[1].mxu0  ;;  %v338_v29 = vpop.f32.mrb[1].mxu1 }
 0x11a   : > { %v327_v30 = vadd.f32 %v326_v28, %v228_v23  ;;  %v339_v31 = vadd.f32 %v338_v29, %v238_v22 }
 0x11b   : > { %347 = vst [vmem:[%s206_s6] sm:$0xff] %v325_v26  ;;  %351 = vst [vmem:[%s206_s6 + $0x20] sm:$0xff] %v337_v27 }
 0x11c   : > { %348 = vst [vmem:[%s206_s6 + $0x8] sm:$0xff] %v327_v30  ;;  %352 = vst [vmem:[%s206_s6 + $0x28] sm:$0xff] %v339_v31  ;;  %v330_v34 = vpop.f32.mrb[2].mxu0  ;;  %v342_v35 = vpop.f32.mrb[2].mxu1 }
 0x11d   : > { %v331_v36 = vadd.f32 %v330_v34, %v233_v33  ;;  %v343_v37 = vadd.f32 %v342_v35, %v243_v32  ;;  %v332_v38 = vpop.f32.mrb[3].mxu0  ;;  %v344_v39 = vpop.f32.mrb[3].mxu1 }
 0x11e   : > { %v333_v40 = vadd.f32 %v332_v38, %v233_v33  ;;  %v345_v41 = vadd.f32 %v344_v39, %v243_v32 }
 0x11f   : > { %349 = vst [vmem:[%s206_s6 + $0x10] sm:$0xff] %v331_v36  ;;  %353 = vst [vmem:[%s206_s6 + $0x30] sm:$0xff] %v343_v37 }
 0x120   : > { %350 = vst [vmem:[%s206_s6 + $0x18] sm:$0xff] %v333_v40  ;;  %354 = vst [vmem:[%s206_s6 + $0x38] sm:$0xff] %v345_v41 }
 0x121   : > { %604 = shalt.err (!%p601_p5)
}
 0x122   : > { %s605_s4 = scalar_lea.hbm %s857_s10, 1024  ;;  %s609_s19 = scalar_lea.hbm %s909_s3, 2048 }
 0x123   : > { %p606_p4 = scmp.ne.s32.totalorder %s857_s10, %s605_s4  ;;  %p610_p12 = scmp.lt.u32.totalorder %s857_s10, %s909_s3 }
 0x124   : > { %p611_p1 = scmp.lt.u32.totalorder %s609_s19, %s605_s4  ;;  %p613_p8 = scmp.lt.u32.totalorder %s605_s4, %s857_s10 }
 0x125   : > { %p607_p7 = pnand %p606_p4, %p917_p9 }
 0x126   : > { %p612_p3 = por %p611_p1, %p610_p12 }
 0x127   : > { %p608_p10 = pneg %p607_p7 }
 0x128   : > { %p614_p11 = por %p613_p8, %p612_p3 }
 0x12a   : > { %p615_p0 = pnand %p614_p11, %p608_p10 }
 0x12c   : > { %618 = shalt.err (!%p615_p0)
}
 0x12d   : > { %s681_s6 = smov 256   ;;  %s682_s9 = smov 16  }
 0x12e   : > { %493 = dma.vmem_to_hbm [thread:$0]  (%p917_p9), %s852_s8, 1024, %s857_s10, %s356_s22, %s681_s6, %s681_s6, %s682_s9  }
 0x12f PF: > { %s386_s18 = sand.u32 1, %s653_s12   ;;  %p918_p6 = scmp.ne.s32.totalorder %s914_s27, 0 }
 0x130   : > { %p919_p13 = scmp.ge.s32.totalorder %s673_s17, 2  ;;  %s387_s15 = scalar_lea.sflag [#allocation4], %s386_s18 }
 0x132   : > { %p500_p2 = pnand %p919_p13, %p918_p6 }
 0x134   : > { %648 = dma.done.wait (!%p500_p2), %s387_s15, 1024  }
 0x135   : > { %650 = vsyncadd (!%p500_p2), %s387_s15, 4294966272  ;;  %s19_s17 = sadd.s32 1, %s673_s17   ;;  %s920_s12 = smov %s657_s13 }
 0x136   : > { %p16_p5 = scmp.ge.s32.totalorder %s19_s17, 4   ;;  %s921_s13 = smov %s661_s14 }
 0x137   : > { %s922_s14 = smov %s759_s26  ;;  %s923_s15 = smov %s669_s16 }
 0x138   : > { %s924_s16 = smov %s926_s20  ;;  %18 = sbr.rel (!%p16_p5) target bundleno = 6 (0x6), region = 77 }
 0x13f   :  { %392 = vsyncpa [#allocation3], 1 }
 0x140   :  { %394 = vsyncpa [#allocation3 + $0x1], 1 }
 0x141   :  { %395 = vsyncpa [#allocation4], 1 }
 0x142   :  { %397 = vsyncpa [#allocation4 + $0x1], 1 }

</bundles_post_ra>
